<compile_context>
chip_gen: v7x
topology: tpu7x:2x2x1
jax: 0.10.0
libtpu: 0.0.40
codegen_flags: <defaults>
</compile_context>

<pallas_src>
import functools

import jax
import jax.numpy as jnp
from jax import lax
from jax.experimental import pallas as pl
from jax.experimental.pallas import tpu as pltpu


def _round_up(x: int, m: int) -> int:
    return ((x + m - 1) // m) * m


def _fused_mlp_kernel(*refs, num_layers: int, dot_precision):
    """Fused MLP tile.

    refs = (x_ref, w0_ref, b0_ref, ..., w{L-1}_ref, b{L-1}_ref, o_ref)
      x_ref : (tile_m, in_dim)        VMEM (input dtype; cast in-kernel)
      wi_ref: (dims[i], dims[i+1])    VMEM (full weight, grid-invariant)
      bi_ref: (1, dims[i+1])          VMEM, f32
      o_ref : (tile_m, out_dim)       VMEM
    """
    x_ref = refs[0]
    o_ref = refs[-1]
    wb = refs[1:-1]

    h = x_ref[...]
    for i in range(num_layers):
        w = wb[2 * i][...]
        b = wb[2 * i + 1][...]
        # MXU matmul in the weight dtype (bf16 on v6e/v7x if requested),
        # always accumulating in f32; intermediates stay f32 between layers.
        y = jnp.dot(h.astype(w.dtype), w,
                    preferred_element_type=jnp.float32,
                    precision=dot_precision)
        y = y + b.astype(jnp.float32)
        if i < num_layers - 1:
            y = jnp.maximum(y, 0.0)
        h = y
    o_ref[...] = h.astype(o_ref.dtype)


# Rows per grid step below which splitting is pure overhead.
_MIN_ROWS_PER_STEP = 512


def mlp_forward(x, params, *, tm: int = 1024, compute_dtype=None):
    """Fused Pallas MLP forward.

    x: [..., input_dim]  (e.g. [batch, seq, input_dim])
    params: list of (W, b) with W shape (in_dim, out_dim) [PyTorch weight.T],
            b shape (out_dim,).
    tm: target M tile (rows per grid step); aligned / balanced automatically.
    compute_dtype: dtype fed to the MXU (e.g. jnp.bfloat16 on v6e/v7x);
                   accumulation is always f32. Defaults to x.dtype.
    """
    lead = x.shape[:-1]
    in_dim = x.shape[-1]
    num_layers = len(params)
    out_dim = params[-1][0].shape[1]
    out_dtype = x.dtype
    compute_dtype = jnp.dtype(compute_dtype or x.dtype)

    x2d = x.reshape(-1, in_dim)   # reshape only; no pad / no astype passes
    M = x2d.shape[0]

    # ---- M tiling ---------------------------------------------------------
    # Sublane packing of the compute dtype (8 for f32, 16 for bf16).
    sub = 16 if compute_dtype == jnp.dtype(jnp.bfloat16) else 8
    tm_aligned = max(sub, _round_up(tm, sub))

    grid_target = pl.cdiv(M, tm_aligned)
    if grid_target == 1 and M >= 2 * _MIN_ROWS_PER_STEP:
        # v7x has 2 TensorCores: make sure a large-M input gives the
        # "parallel" axis at least 2 balanced steps to shard across them.
        grid_target = 2
    if grid_target == 1:
        # Single step: block dim == full array dim (always a legal block
        # shape, even when M is not a multiple of 8).
        tile_m = M
    else:
        tile_m = _round_up(pl.cdiv(M, grid_target), sub)
    grid_m = pl.cdiv(M, tile_m)   # last tile may be ragged; Pallas masks it

    # ---- inputs & specs ---------------------------------------------------
    args = [x2d]
    in_specs = [pl.BlockSpec((tile_m, in_dim), lambda i: (i, 0))]
    for w, b in params:
        wi = w.astype(compute_dtype)               # tiny, one-time cast
        bi = b.astype(jnp.float32).reshape(1, -1)
        args.append(wi)
        args.append(bi)
        # Grid-invariant, full-block resident weights / biases.
        in_specs.append(pl.BlockSpec(wi.shape, lambda i: (0, 0)))
        in_specs.append(pl.BlockSpec(bi.shape, lambda i: (0, 0)))

    # f32 compute: force exact f32 matmul (otherwise TPU default precision
    # uses reduced-precision passes). bf16 compute: default precision.
    dot_precision = (lax.Precision.HIGHEST
                     if compute_dtype == jnp.dtype(jnp.float32) else None)

    # ---- VMEM budget (real footprint + margin, not a blanket number) ------
    max_width = max(in_dim, max(w.shape[1] for w, _ in params))
    est = 2 * tile_m * in_dim * x2d.dtype.itemsize            # x double-buffer
    est += 2 * tile_m * out_dim * jnp.dtype(out_dtype).itemsize  # out double-buffer
    est += 4 * tile_m * max_width * 4                         # f32 intermediates
    for w, b in params:                                       # resident constants
        est += 2 * (w.size * compute_dtype.itemsize + b.size * 4)
    vmem_limit = int(min(max(2 * est, 4 << 20), 32 << 20))

    kernel = functools.partial(_fused_mlp_kernel,
                               num_layers=num_layers,
                               dot_precision=dot_precision)

    out = pl.pallas_call(
        kernel,
        out_shape=jax.ShapeDtypeStruct((M, out_dim), out_dtype),
        grid_spec=pltpu.PrefetchScalarGridSpec(
            num_scalar_prefetch=0,
            grid=(grid_m,),
            in_specs=in_specs,
            # Output block last dim == full array dim (no lane padding):
            # writeback bytes are out_dim/row, not 128/row.
            out_specs=pl.BlockSpec((tile_m, out_dim), lambda i: (i, 0)),
        ),
        compiler_params=pltpu.CompilerParams(
            dimension_semantics=("parallel",),
            vmem_limit_bytes=vmem_limit,
        ),
    )(*args)

    return out.reshape(*lead, out_dim)


def init_mlp_params(key, input_dim, hidden_dim, output_dim, num_layers):
    """Deterministic init matching nn.Linear shapes (uniform +/- 1/sqrt(fan_in))."""
    h = [hidden_dim] * (num_layers - 1)
    dims_in = [input_dim] + h
    dims_out = h + [output_dim]
    params = []
    for n, k in zip(dims_in, dims_out):
        key, kw, kb = jax.random.split(key, 3)
        bound = 1.0 / jnp.sqrt(jnp.float32(n))
        # stored as (in_dim, out_dim) == PyTorch weight.T
        w = jax.random.uniform(kw, (n, k), jnp.float32, -bound, bound)
        b = jax.random.uniform(kb, (k,), jnp.float32, -bound, bound)
        params.append((w, b))
    return params


def mlp_reference(x, params):
    """Plain-JAX reference of the same forward pass."""
    num_layers = len(params)
    for i, (w, b) in enumerate(params):
        x = jnp.dot(x, w, precision=lax.Precision.HIGHEST) + b
        if i < num_layers - 1:
            x = jax.nn.relu(x)
    return x


if __name__ == "__main__":
    key = jax.random.PRNGKey(0)
    kx, kp, kx2, kx3 = jax.random.split(key, 4)

    # Shapes consistent with the VisTR bbox head usage:
    # x: [batch=2, seq=8, input_dim=32], hidden=32, output=4, num_layers=3.
    batch, seq, input_dim = 2, 8, 32
    hidden_dim, output_dim, num_layers = 32, 4, 3

    params = init_mlp_params(kp, input_dim, hidden_dim, output_dim, num_layers)

    # Small shape: single-tile path (block dims == full array dims).
    x = jax.random.normal(kx, (batch, seq, input_dim), jnp.float32)
    out = jax.block_until_ready(mlp_forward(x, params))
    ref = mlp_reference(x, params)
    assert out.shape == (batch, seq, output_dim), out.shape
    assert jnp.allclose(out, ref, atol=1e-5, rtol=1e-5), (
        float(jnp.max(jnp.abs(out - ref))))

    # VisTR-head-sized M (~600 rows): single grid step, no wrapper pad/astype.
    x_mid = jax.random.normal(kx2, (2, 300, input_dim), jnp.float32)
    out_mid = jax.block_until_ready(mlp_forward(x_mid, params))
    ref_mid = mlp_reference(x_mid, params)
    assert jnp.allclose(out_mid, ref_mid, atol=1e-5, rtol=1e-5), (
        float(jnp.max(jnp.abs(out_mid - ref_mid))))

    # Larger M: multi-step "parallel" grid with a ragged last tile.
    x_big = jax.random.normal(kx3, (2, 1111, input_dim), jnp.float32)
    out_big = jax.block_until_ready(mlp_forward(x_big, params, tm=1024))
    ref_big = mlp_reference(x_big, params)
    assert jnp.allclose(out_big, ref_big, atol=1e-5, rtol=1e-5), (
        float(jnp.max(jnp.abs(out_big - ref_big))))

    # bf16-in / f32-accumulate path (what you'd run on v6e/v7x MXUs).
    out_bf16 = jax.block_until_ready(
        mlp_forward(x_big, params, tm=1024, compute_dtype=jnp.bfloat16))
    assert jnp.allclose(out_bf16, ref_big, atol=5e-2, rtol=5e-2), (
        float(jnp.max(jnp.abs(out_bf16 - ref_big))))

    print("KERNEL_OK")
</pallas_src>

<mosaic_0001>
module attributes {stable_mosaic.version = 11 : i64} {
  func.func @_fused_mlp_kernel(%arg0: i32, %arg1: memref<16x32xf32, #tpu.memory_space<vmem>>, %arg2: memref<32x32xf32, #tpu.memory_space<vmem>>, %arg3: memref<1x32xf32, #tpu.memory_space<vmem>>, %arg4: memref<32x32xf32, #tpu.memory_space<vmem>>, %arg5: memref<1x32xf32, #tpu.memory_space<vmem>>, %arg6: memref<32x4xf32, #tpu.memory_space<vmem>>, %arg7: memref<1x4xf32, #tpu.memory_space<vmem>>, %arg8: memref<16x4xf32, #tpu.memory_space<vmem>>) attributes {dimension_semantics = [#tpu.dimension_semantics<parallel>], iteration_bounds = array<i64: 1>, scalar_prefetch = 0 : i64, scratch_operands = 0 : i64, tpu.core_type = #tpu.core_type<tc>, window_params = [{transform_indices = @transform_0, window_bounds = array<i64: 16, 32>}, {pipeline_mode = #tpu.pipeline_mode<synchronous>, transform_indices = @transform_1, window_bounds = array<i64: 32, 32>}, {pipeline_mode = #tpu.pipeline_mode<synchronous>, transform_indices = @transform_2, window_bounds = array<i64: 1, 32>}, {pipeline_mode = #tpu.pipeline_mode<synchronous>, transform_indices = @transform_3, window_bounds = array<i64: 32, 32>}, {pipeline_mode = #tpu.pipeline_mode<synchronous>, transform_indices = @transform_4, window_bounds = array<i64: 1, 32>}, {pipeline_mode = #tpu.pipeline_mode<synchronous>, transform_indices = @transform_5, window_bounds = array<i64: 32, 4>}, {pipeline_mode = #tpu.pipeline_mode<synchronous>, transform_indices = @transform_6, window_bounds = array<i64: 1, 4>}, {transform_indices = @transform_7, window_bounds = array<i64: 16, 4>}]} {
    %c0 = arith.constant 0 : index
    %c0_0 = arith.constant 0 : index
    %0 = vector.load %arg1[%c0, %c0_0] : memref<16x32xf32, #tpu.memory_space<vmem>>, vector<16x32xf32>
    %c0_1 = arith.constant 0 : index
    %c0_2 = arith.constant 0 : index
    %1 = vector.load %arg2[%c0_1, %c0_2] : memref<32x32xf32, #tpu.memory_space<vmem>>, vector<32x32xf32>
    %c0_3 = arith.constant 0 : index
    %c0_4 = arith.constant 0 : index
    %2 = vector.load %arg3[%c0_3, %c0_4] : memref<1x32xf32, #tpu.memory_space<vmem>>, vector<1x32xf32>
    %cst = arith.constant dense<0.000000e+00> : vector<16x32xf32>
    %3 = tpu.matmul %0, %1, %cst {dimension_numbers = #tpu.dot_dimension_numbers<[1], [0], [0], [1], [0, 0, 1, 1], [], []>, precision = #tpu.contract_precision<fp32>} : vector<16x32xf32>, vector<32x32xf32>, vector<16x32xf32> -> vector<16x32xf32>
    %4 = vector.broadcast %2 : vector<1x32xf32> to vector<16x32xf32>
    %5 = arith.addf %3, %4 : vector<16x32xf32>
    %cst_5 = arith.constant 0.000000e+00 : f32
    %6 = vector.broadcast %cst_5 : f32 to vector<16x32xf32>
    %7 = arith.maximumf %5, %6 : vector<16x32xf32>
    %c0_6 = arith.constant 0 : index
    %c0_7 = arith.constant 0 : index
    %8 = vector.load %arg4[%c0_6, %c0_7] : memref<32x32xf32, #tpu.memory_space<vmem>>, vector<32x32xf32>
    %c0_8 = arith.constant 0 : index
    %c0_9 = arith.constant 0 : index
    %9 = vector.load %arg5[%c0_8, %c0_9] : memref<1x32xf32, #tpu.memory_space<vmem>>, vector<1x32xf32>
    %cst_10 = arith.constant dense<0.000000e+00> : vector<16x32xf32>
    %10 = tpu.matmul %7, %8, %cst_10 {dimension_numbers = #tpu.dot_dimension_numbers<[1], [0], [0], [1], [0, 0, 1, 1], [], []>, precision = #tpu.contract_precision<fp32>} : vector<16x32xf32>, vector<32x32xf32>, vector<16x32xf32> -> vector<16x32xf32>
    %11 = vector.broadcast %9 : vector<1x32xf32> to vector<16x32xf32>
    %12 = arith.addf %10, %11 : vector<16x32xf32>
    %cst_11 = arith.constant 0.000000e+00 : f32
    %13 = vector.broadcast %cst_11 : f32 to vector<16x32xf32>
    %14 = arith.maximumf %12, %13 : vector<16x32xf32>
    %c0_12 = arith.constant 0 : index
    %c0_13 = arith.constant 0 : index
    %15 = vector.load %arg6[%c0_12, %c0_13] : memref<32x4xf32, #tpu.memory_space<vmem>>, vector<32x4xf32>
    %c0_14 = arith.constant 0 : index
    %c0_15 = arith.constant 0 : index
    %16 = vector.load %arg7[%c0_14, %c0_15] : memref<1x4xf32, #tpu.memory_space<vmem>>, vector<1x4xf32>
    %cst_16 = arith.constant dense<0.000000e+00> : vector<16x4xf32>
    %17 = tpu.matmul %14, %15, %cst_16 {dimension_numbers = #tpu.dot_dimension_numbers<[1], [0], [0], [1], [0, 0, 1, 1], [], []>, precision = #tpu.contract_precision<fp32>} : vector<16x32xf32>, vector<32x4xf32>, vector<16x4xf32> -> vector<16x4xf32>
    %18 = vector.broadcast %16 : vector<1x4xf32> to vector<16x4xf32>
    %19 = arith.addf %17, %18 : vector<16x4xf32>
    %c0_17 = arith.constant 0 : index
    %c0_18 = arith.constant 0 : index
    %20 = vector.load %arg8[%c0_17, %c0_18] : memref<16x4xf32, #tpu.memory_space<vmem>>, vector<16x4xf32>
    tpu.vector_store %arg8[%c0_17, %c0_18], %19 {strides = array<i32>} : memref<16x4xf32, #tpu.memory_space<vmem>>, vector<16x4xf32>,
    return
  }
  func.func @transform_0(%arg0: i32) -> (i32, i32) {
    %c0_i32 = arith.constant 0 : i32
    %c0_i32_0 = arith.constant 0 : i32
    return %arg0, %c0_i32 : i32, i32
  }
  func.func @transform_1(%arg0: i32) -> (i32, i32) {
    %c0_i32 = arith.constant 0 : i32
    %c0_i32_0 = arith.constant 0 : i32
    %c0_i32_1 = arith.constant 0 : i32
    return %c0_i32, %c0_i32_0 : i32, i32
  }
  func.func @transform_2(%arg0: i32) -> (i32, i32) {
    %c0_i32 = arith.constant 0 : i32
    %c0_i32_0 = arith.constant 0 : i32
    %c0_i32_1 = arith.constant 0 : i32
    return %c0_i32, %c0_i32_0 : i32, i32
  }
  func.func @transform_3(%arg0: i32) -> (i32, i32) {
    %c0_i32 = arith.constant 0 : i32
    %c0_i32_0 = arith.constant 0 : i32
    %c0_i32_1 = arith.constant 0 : i32
    return %c0_i32, %c0_i32_0 : i32, i32
  }
  func.func @transform_4(%arg0: i32) -> (i32, i32) {
    %c0_i32 = arith.constant 0 : i32
    %c0_i32_0 = arith.constant 0 : i32
    %c0_i32_1 = arith.constant 0 : i32
    return %c0_i32, %c0_i32_0 : i32, i32
  }
  func.func @transform_5(%arg0: i32) -> (i32, i32) {
    %c0_i32 = arith.constant 0 : i32
    %c0_i32_0 = arith.constant 0 : i32
    %c0_i32_1 = arith.constant 0 : i32
    return %c0_i32, %c0_i32_0 : i32, i32
  }
  func.func @transform_6(%arg0: i32) -> (i32, i32) {
    %c0_i32 = arith.constant 0 : i32
    %c0_i32_0 = arith.constant 0 : i32
    %c0_i32_1 = arith.constant 0 : i32
    return %c0_i32, %c0_i32_0 : i32, i32
  }
  func.func @transform_7(%arg0: i32) -> (i32, i32) {
    %c0_i32 = arith.constant 0 : i32
    %c0_i32_0 = arith.constant 0 : i32
    return %arg0, %c0_i32 : i32, i32
  }
}

</mosaic_0001>

<bundles_post_ra>
// kernel: tpu_custom_call.1
= control target key start
LH: loop header
LB: loop body
LE: loop exit
PB: predicated region body
PF: predicated region fallthrough
CT: control target
= control target key end

     0   :  { %12 = vsyncpa [#allocation3], 0  ;;  %s2403_s0 = inlined_call_operand.hbm [shape: f32[16,32], index: 0, kind: input, shape index: {}]   ;;  %s2404_s1 = inlined_call_operand.vmem [shape: f32[32,32], index: 1, kind: input, shape index: {}]   ;;  %s2405_s2 = inlined_call_operand.vmem [shape: f32[1,32], index: 2, kind: input, shape index: {}]   ;;  %s2406_s3 = inlined_call_operand.hbm [shape: f32[32,32], index: 3, kind: input, shape index: {}]   ;;  %s2407_s4 = inlined_call_operand.vmem [shape: f32[1,32], index: 4, kind: input, shape index: {}]   ;;  %s2408_s5 = inlined_call_operand.vmem [shape: f32[32,4], index: 5, kind: input, shape index: {}]   ;;  %s2409_s6 = inlined_call_operand.vmem [shape: f32[1,4], index: 6, kind: input, shape index: {}]   ;;  %s2410_s7 = inlined_call_operand.vmem [shape: f32[16,4], index: 7, kind: output, shape index: {}]  }
   0x1   :  { %13 = vsyncpa [#allocation5], 0  ;;  %s2246_s24 = smov [#allocation2]   ;;  %s2198_s28 = scalar_lea.hbm %s2403_s0, 256 }
   0x2   :  { %s19_s25 = sshll.u32 %s2246_s24, 4  ;;  %p2199_p0 = scmp.ne.s32.totalorder %s2403_s0, %s2198_s28  ;;  %s20_s25 = int_to_ptr.vmem [resolvable:$true] %s19_s25 }
   0x3   :  { %p2202_p1 = scmp.lt.u32.totalorder %s2198_s28, %s2403_s0 }
   0x5   :  { %p2204_p2 = pnand %p2202_p1, %p2199_p0 }
   0x7   :  { %2207 = shalt.err (!%p2204_p2)
}
   0x8   :  { %s2208_s10 = scalar_lea.vmem %s20_s25, 256  ;;  %p2213_p4 = scmp.lt.s32.totalorder %s20_s25, %s20_s25 }
   0x9   :  { %p2209_p3 = scmp.ne.s32.totalorder %s20_s25, %s2208_s10  ;;  %p2214_p5 = scmp.lt.s32.totalorder %s2208_s10, %s2208_s10 }
   0xb   :  { %p2215_p6 = por %p2214_p5, %p2213_p4 }
   0xd   :  { %p2216_p7 = pnand %p2215_p6, %p2209_p3 }
   0xf   :  { %2219 = shalt.err (!%p2216_p7)
}
  0x10   :  { %s2247_s11 = smov 128   ;;  %s2248_s12 = smov 8  }
  0x11   :  { %25 = dma.hbm_to_vmem [thread:$0]  %s2403_s0, 256, %s20_s25, [#allocation3], %s2247_s11, %s2247_s11, %s2248_s12  }
  0x12   :  { %s2249_s15 = smov [#allocation4]   ;;  %s2220_s19 = scalar_lea.hbm %s2406_s3, 512 }
  0x13   :  { %s35_s16 = sshll.u32 %s2249_s15, 4  ;;  %p2221_p8 = scmp.ne.s32.totalorder %s2406_s3, %s2220_s19  ;;  %s36_s16 = int_to_ptr.vmem [resolvable:$true] %s35_s16 }
  0x14   :  { %p2224_p9 = scmp.lt.u32.totalorder %s2220_s19, %s2406_s3 }
  0x16   :  { %p2226_p10 = pnand %p2224_p9, %p2221_p8 }
  0x18   :  { %2229 = shalt.err (!%p2226_p10)
}
  0x19   :  { %s2230_s24 = scalar_lea.vmem %s36_s16, 512  ;;  %p2235_p12 = scmp.lt.s32.totalorder %s36_s16, %s36_s16 }
  0x1a   :  { %p2231_p11 = scmp.ne.s32.totalorder %s36_s16, %s2230_s24  ;;  %p2236_p13 = scmp.lt.s32.totalorder %s2230_s24, %s2230_s24 }
  0x1c   :  { %p2237_p0 = por %p2236_p13, %p2235_p12 }
  0x1e   :  { %p2238_p1 = pnand %p2237_p0, %p2231_p11 }
  0x20   :  { %2241 = shalt.err (!%p2238_p1)
}
  0x21   :  { %41 = dma.hbm_to_vmem [thread:$0]  %s2406_s3, 512, %s36_s16, [#allocation5], %s2247_s11, %s2247_s11, %s2248_s12  }
  0x22   :  { %2242 = dma.done.wait [#allocation3], 256  }
  0x23   :  { %2243 = vsyncadd [#allocation3], 4294967040 }
  0x24   :  { %2244 = dma.done.wait [#allocation5], 512  }
  0x25   :  { %2245 = vsyncadd [#allocation5], 4294966784  ;;  %vm67_vm0 = vcmask 261120   ;;  %v56_v0 = vld [vmem:[%s2404_s1] sm:$0xff]  ;;  %v57_v1 = vld [vmem:[%s2404_s1 + $0x8] sm:$0xff]  ;;  %vm1696_vm1 = vcmask 31744  }
  0x26   :  { %v58_v2 = vld [vmem:[%s2404_s1 + $0x10] sm:$0xff]  ;;  %v75_v3 = vand.u32 4294901760, %v56_v0  ;;  %v78_v4 = vand.u32 4294901760, %v57_v1  ;;  %v59_v5 = vld [vmem:[%s2404_s1 + $0x18] sm:$0xff]  ;;  %v54_v7 = vld [vmem:[#allocation2] sm:$0xff] }
  0x27   :  { %v81_v6 = vand.u32 4294901760, %v58_v2  ;;  %v55_v8 = vld [vmem:[#allocation2 + $0x8] sm:$0xff]  ;;  %v84_v9 = vand.u32 4294901760, %v59_v5  ;;  %v69_v10 = vsel %vm67_vm0, %v54_v7, 0  ;;  %v604_v46 = vld [vmem:[#allocation4] sm:$0xff]  ;;  %v605_v47 = vld [vmem:[#allocation4 + $0x8] sm:$0xff] }
  0x28   :  { %v72_v11 = vsel %vm67_vm0, %v55_v8, 0  ;;  %v2014_v12 = vpack.c.bf16 %v78_v4, %v75_v3  ;;  %v2328_v13 = vand.u32 4294901760, %v69_v10  ;;  %v165_v15 = vsub.f32 %v56_v0, %v75_v3  ;;  %v606_v53 = vld [vmem:[#allocation4 + $0x10] sm:$0xff]  ;;  %v607_v54 = vld [vmem:[#allocation4 + $0x18] sm:$0xff] }
  0x29   :  { %v2330_v14 = vand.u32 4294901760, %v72_v11  ;;  %v2018_v16 = vpack.c.bf16 %v84_v9, %v81_v6  ;;  %v172_v17 = vsub.f32 %v57_v1, %v78_v4  ;;  %v179_v18 = vsub.f32 %v58_v2, %v81_v6 }
  0x2a   :  { %v186_v19 = vsub.f32 %v59_v5, %v84_v9  ;;  %2015 = vmatprep.subr.bf16.mxu1 %v2014_v12  ;;  %2039 = vmatprep.subr.bf16.mxu0 %v2014_v12  ;;  %v144_v20 = vsub.f32 %v69_v10, %v2328_v13  ;;  %v166_v22 = vand.u32 4294901760, %v165_v15  ;;  %v622_v48 = vand.u32 4294901760, %v604_v46 }
  0x2b   :  { %v154_v21 = vsub.f32 %v72_v11, %v2330_v14  ;;  %2017 = vmatpush3.bf16.msra.mxu1 %v2014_v12  ;;  %2041 = vmatpush3.bf16.msra.mxu0 %v2014_v12  ;;  %v173_v23 = vand.u32 4294901760, %v172_v17  ;;  %v180_v24 = vand.u32 4294901760, %v179_v18  ;;  %v2030_v44 = vpack.c.bf16 %v172_v17, %v165_v15 }
  0x2c   :  { %v187_v25 = vand.u32 4294901760, %v186_v19  ;;  %2019 = vmatprep.subr.bf16.mxu1 %v2018_v16  ;;  %2043 = vmatprep.subr.bf16.mxu0 %v2018_v16  ;;  %v145_v26 = vand.u32 4294901760, %v144_v20  ;;  %v167_v28 = vsub.f32 %v165_v15, %v166_v22  ;;  %v2034_v45 = vpack.c.bf16 %v186_v19, %v179_v18 }
  0x2d   :  { %v155_v27 = vand.u32 4294901760, %v154_v21  ;;  %v174_v29 = vsub.f32 %v172_v17, %v173_v23  ;;  %v2046_v30 = vpack.c.bf16 %v173_v23, %v166_v22  ;;  %v181_v31 = vsub.f32 %v179_v18, %v180_v24 }
  0x2e   :  { %v188_v32 = vsub.f32 %v186_v19, %v187_v25  ;;  %v146_v33 = vsub.f32 %v144_v20, %v145_v26  ;;  %1857 = vmatprep.mubr.f32.mxu0 %v145_v26  ;;  %v168_v35 = vand.u32 4294901760, %v167_v28  ;;  %v2050_v43 = vpack.c.bf16 %v187_v25, %v180_v24 }
  0x2f   :  { %v156_v34 = vsub.f32 %v154_v21, %v155_v27  ;;  %2021 = vmatpush3.bf16.msra.mxu1 %v2018_v16  ;;  %2045 = vmatpush3.bf16.msra.mxu0 %v2018_v16  ;;  %v175_v36 = vand.u32 4294901760, %v174_v29  ;;  %v182_v37 = vand.u32 4294901760, %v181_v31  ;;  %v625_v49 = vand.u32 4294901760, %v605_v47 }
  0x30   :  { %v189_v38 = vand.u32 4294901760, %v188_v32  ;;  %v147_v39 = vand.u32 4294901760, %v146_v33  ;;  %2047 = vmatprep.subr.bf16.mxu0 %v2046_v30  ;;  %v712_v51 = vsub.f32 %v604_v46, %v622_v48  ;;  %v628_v55 = vand.u32 4294901760, %v606_v53 }
  0x31   :  { %v157_v40 = vand.u32 4294901760, %v156_v34  ;;  %v2022_v41 = vpack.c.bf16 %v175_v36, %v168_v35  ;;  %v2340_v50 = vpack.c.bf16 %v625_v49, %v622_v48  ;;  %v719_v52 = vsub.f32 %v605_v47, %v625_v49 }
  0x32   :  { %v2026_v42 = vpack.c.bf16 %v189_v38, %v182_v37  ;;  %1824 = vmatprep.mubr.f32.mxu1 %v147_v39  ;;  %1858 = vmatmul.mubr.f32.vlgmr.msra.gmra.mrb[0].mxu0 %v155_v27  ;;  %v631_v56 = vand.u32 4294901760, %v607_v54  ;;  %v713_v57 = vand.u32 4294901760, %v712_v51  ;;  %v726_v62 = vsub.f32 %v606_v53, %v628_v55  ;;  %v1151_v37 = vld [vmem:[%s2408_s5] sm:$0xff]  ;;  %v1152_v38 = vld [vmem:[%s2408_s5 + $0x8] sm:$0xff] }
  0x33   :  { %1825 = vmatmul.mubr.f32.vlgmr.msra.gmra.mrb[0].mxu1 %v157_v40  ;;  %2023 = vmatprep.subr.bf16.mxu1 %v2022_v41  ;;  %v720_v58 = vand.u32 4294901760, %v719_v52  ;;  %v2078_v10 = vpack.c.bf16 %v719_v52, %v712_v51  ;;  %v1169_v39 = vand.u32 4294901760, %v1151_v37  ;;  %v1172_v40 = vand.u32 4294901760, %v1152_v38 }
  0x34   :  { %2025 = vmatpush3.bf16.msra.mxu1 %v2022_v41  ;;  %2049 = vmatpush3.bf16.msra.mxu0 %v2046_v30  ;;  %v2344_v59 = vpack.c.bf16 %v631_v56, %v628_v55  ;;  %v714_v60 = vsub.f32 %v712_v51, %v713_v57  ;;  %v733_v63 = vsub.f32 %v607_v54, %v631_v56  ;;  %v727_v2 = vand.u32 4294901760, %v726_v62 }
  0x35   :  { %2027 = vmatprep.subr.bf16.mxu1 %v2026_v42  ;;  %2051 = vmatprep.subr.bf16.mxu0 %v2050_v43  ;;  %v721_v61 = vsub.f32 %v719_v52, %v720_v58  ;;  %v2367_v41 = vpack.c.bf16 %v1172_v40, %v1169_v39 }
  0x36   :  { %1835 = vmatprep.mubr.f32.mxu1 %v2328_v13  ;;  %1868 = vmatprep.mubr.f32.mxu0 %v2328_v13  ;;  %v715_v0 = vand.u32 4294901760, %v714_v60  ;;  %v734_v3 = vand.u32 4294901760, %v733_v63  ;;  %v728_v5 = vsub.f32 %v726_v62, %v727_v2  ;;  %v2082_v11 = vpack.c.bf16 %v733_v63, %v726_v62 }
  0x37   :  { %v722_v1 = vand.u32 4294901760, %v721_v61 }
  0x38   :  { %2029 = vmatpush3.bf16.msra.mxu1 %v2026_v42  ;;  %2053 = vmatpush3.bf16.msra.mxu0 %v2050_v43  ;;  %v735_v6 = vsub.f32 %v733_v63, %v734_v3  ;;  %v729_v7 = vand.u32 4294901760, %v728_v5  ;;  %v1259_v42 = vsub.f32 %v1151_v37, %v1169_v39  ;;  %v1266_v43 = vsub.f32 %v1152_v38, %v1172_v40  ;;  %v1706_v5 = vld [vmem:[%s2407_s4] ss:$0 sm:$0xff] }
  0x39   :  { %2031 = vmatprep.subr.bf16.mxu1 %v2030_v44  ;;  %2055 = vmatprep.subr.bf16.mxu0 %v2014_v12  ;;  %v2070_v4 = vpack.c.bf16 %v722_v1, %v715_v0 }
  0x3a   :  { %v736_v8 = vand.u32 4294901760, %v735_v6  ;;  %v1260_v48 = vand.u32 4294901760, %v1259_v42  ;;  %v1267_v49 = vand.u32 4294901760, %v1266_v43  ;;  %v2126_v1 = vpack.c.bf16 %v1266_v43, %v1259_v42 }
  0x3b   :  { %1836 = vmatmul.mubr.f32.vlgmr.msra.gmra.mrb[0].mxu1 %v2330_v14  ;;  %1869 = vmatmul.mubr.f32.vlgmr.msra.gmra.mrb[0].mxu0 %v2330_v14 }
  0x3c   :  { %2033 = vmatpush3.bf16.msra.mxu1 %v2030_v44  ;;  %2057 = vmatpush3.bf16.msra.mxu0 %v2014_v12  ;;  %v2074_v9 = vpack.c.bf16 %v736_v8, %v729_v7  ;;  %v2094_v12 = vpack.c.bf16 %v720_v58, %v713_v57  ;;  %v1153_v44 = vld [vmem:[%s2408_s5 + $0x10] sm:$0xff]  ;;  %v1261_v51 = vsub.f32 %v1259_v42, %v1260_v48 }
  0x3d   :  { %2035 = vmatprep.subr.bf16.mxu1 %v2034_v45  ;;  %2059 = vmatprep.subr.bf16.mxu0 %v2018_v16  ;;  %v1175_v46 = vand.u32 4294901760, %v1153_v44  ;;  %v1268_v52 = vsub.f32 %v1266_v43, %v1267_v49 }
  0x3e   :  { %1846 = vmatprep.mubr.f32.mxu1 %v144_v20  ;;  %1879 = vmatprep.mubr.f32.mxu0 %v2328_v13  ;;  %v2098_v13 = vpack.c.bf16 %v734_v3, %v727_v2  ;;  %v1262_v55 = vand.u32 4294901760, %v1261_v51  ;;  %v2142_v3 = vpack.c.bf16 %v1267_v49, %v1260_v48 }
  0x3f   :  { %v1273_v53 = vsub.f32 %v1153_v44, %v1175_v46  ;;  %v1269_v56 = vand.u32 4294901760, %v1268_v52 }
  0x40   :  { %2037 = vmatpush3.bf16.msra.mxu1 %v2034_v45  ;;  %2061 = vmatpush3.bf16.msra.mxu0 %v2018_v16  ;;  %v1154_v45 = vld [vmem:[%s2408_s5 + $0x18] sm:$0xff] }
  0x41   :  { %2063 = vmatprep.subr.bf16.mxu1 %v2340_v50  ;;  %2111 = vmatprep.subr.bf16.mxu0 %v2367_v41  ;;  %v1178_v47 = vand.u32 4294901760, %v1154_v45  ;;  %v1274_v57 = vand.u32 4294901760, %v1273_v53 }
  0x43   :  { %1847 = vmatmul.mubr.f32.vlgmr.msra.gmra.mrb[0].mxu1 %v154_v21  ;;  %1880 = vmatmul.mubr.f32.vlgmr.msra.gmra.mrb[0].mxu0 %v2330_v14  ;;  %v1705_v14 = vld [vmem:[%s2405_s2] ss:$0 sm:$0xff]  ;;  %v1280_v54 = vsub.f32 %v1154_v45, %v1178_v47  ;;  %v1275_v60 = vsub.f32 %v1273_v53, %v1274_v57 }
  0x44   :  { %2065 = vmatpush3.bf16.msra.mxu1 %v2340_v50  ;;  %2113 = vmatpush3.bf16.msra.mxu0 %v2367_v41 }
  0x45   :  { %2067 = vmatprep.subr.bf16.mxu1 %v2344_v59  ;;  %v1281_v58 = vand.u32 4294901760, %v1280_v54  ;;  %v1276_v62 = vand.u32 4294901760, %v1275_v60  ;;  %v2130_v2 = vpack.c.bf16 %v1280_v54, %v1273_v53 }
  0x47   :  { %v1282_v61 = vsub.f32 %v1280_v54, %v1281_v58 }
  0x48   :  { %2069 = vmatpush3.bf16.msra.mxu1 %v2344_v59 }
  0x49   :  { %2071 = vmatprep.subr.bf16.mxu1 %v2070_v4  ;;  %v1283_v63 = vand.u32 4294901760, %v1282_v61 }
  0x4b   :  { %v2122_v0 = vpack.c.bf16 %v1283_v63, %v1276_v62 }
 0x116   :  { %v1848_v15 = vpop.f32.mrb[0].mxu1  ;;  %v1881_v16 = vpop.f32.mrb[0].mxu0 }
 0x117   :  { %v2158_v17 = vadd.f32 %v1848_v15, %v1705_v14  ;;  %v336_v18 = vpop.f32.mrb[1].mxu1  ;;  %v592_v19 = vpop.f32.mrb[1].mxu0 }
 0x118   :  { %v2160_v20 = vadd.f32 %v1705_v14, %v336_v18 }
 0x119   :  { %v2159_v21 = vadd.f32 %v2158_v17, %v1881_v16 }
 0x11a   :  { %v2161_v22 = vadd.f32 %v2160_v20, %v592_v19 }
 0x11b   :  { %v603_v23 = vmax.f32 %v2159_v21, 0.0 }
 0x11c   :  { %v602_v24 = vmax.f32 %v2161_v22, 0.0 }
 0x11d   :  { %v619_v25 = vsel %vm67_vm0, %v603_v23, 0 }
 0x11e   :  { %v700_v26 = vand.u32 4294901760, %v619_v25  ;;  %v616_v27 = vsel %vm67_vm0, %v602_v24, 0  ;;  %v1707_v24 = vld [vmem:[%s2409_s6] ss:$0 sm:$0xff] }
 0x11f   :  { %v690_v28 = vand.u32 4294901760, %v616_v27 }
 0x120   :  { %v701_v29 = vsub.f32 %v619_v25, %v700_v26 }
 0x121   :  { %v691_v30 = vsub.f32 %v616_v27, %v690_v28 }
 0x122   :  { %v702_v31 = vand.u32 4294901760, %v701_v29 }
 0x123   :  { %v692_v32 = vand.u32 4294901760, %v691_v30 }
 0x124   :  { %v703_v33 = vsub.f32 %v701_v29, %v702_v31 }
 0x125   :  { %v693_v34 = vsub.f32 %v691_v30, %v692_v32 }
 0x126   :  { %v704_v36 = vand.u32 4294901760, %v703_v33 }
 0x127   :  { %v694_v35 = vand.u32 4294901760, %v693_v34 }
 0x129   :  { %1890 = vmatprep.mubr.f32.mxu1 %v694_v35 }
 0x12a   :  { %1891 = vmatmul.mubr.f32.vlgmr.msra.gmra.mrb[2].mxu1 %v704_v36 }
 0x12b   :  { %2073 = vmatpush3.bf16.msra.mxu1 %v2070_v4  ;;  %1901 = vmatprep.mubr.f32.mxu1 %v690_v28  ;;  %v2146_v4 = vpack.c.bf16 %v1281_v58, %v1274_v57 }
 0x12c   :  { %2075 = vmatprep.subr.bf16.mxu1 %v2074_v9 }
 0x12f   :  { %2077 = vmatpush3.bf16.msra.mxu1 %v2074_v9 }
 0x130   :  { %2079 = vmatprep.subr.bf16.mxu1 %v2078_v10 }
 0x132   :  { %1902 = vmatmul.mubr.f32.vlgmr.msra.gmra.mrb[2].mxu1 %v700_v26 }
 0x133   :  { %2081 = vmatpush3.bf16.msra.mxu1 %v2078_v10  ;;  %1912 = vmatprep.mubr.f32.mxu1 %v691_v30 }
 0x134   :  { %2083 = vmatprep.subr.bf16.mxu1 %v2082_v11 }
 0x137   :  { %2085 = vmatpush3.bf16.msra.mxu1 %v2082_v11 }
 0x138   :  { %2087 = vmatprep.subr.bf16.mxu1 %v2340_v50 }
 0x13a   :  { %1913 = vmatmul.mubr.f32.vlgmr.msra.gmra.mrb[2].mxu1 %v701_v29 }
 0x13b   :  { %2089 = vmatpush3.bf16.msra.mxu1 %v2340_v50  ;;  %1923 = vmatprep.mubr.f32.mxu1 %v692_v32 }
 0x13c   :  { %2091 = vmatprep.subr.bf16.mxu1 %v2344_v59 }
 0x13f   :  { %2093 = vmatpush3.bf16.msra.mxu1 %v2344_v59 }
 0x140   :  { %2095 = vmatprep.subr.bf16.mxu1 %v2094_v12 }
 0x142   :  { %1924 = vmatmul.mubr.f32.vlgmr.msra.gmra.mrb[2].mxu1 %v702_v31 }
 0x143   :  { %2097 = vmatpush3.bf16.msra.mxu1 %v2094_v12  ;;  %1934 = vmatprep.mubr.f32.mxu1 %v690_v28 }
 0x144   :  { %2099 = vmatprep.subr.bf16.mxu1 %v2098_v13 }
 0x147   :  { %2101 = vmatpush3.bf16.msra.mxu1 %v2098_v13 }
 0x148   :  { %2103 = vmatprep.subr.bf16.mxu1 %v2340_v50 }
 0x14a   :  { %1935 = vmatmul.mubr.f32.vlgmr.msra.gmra.mrb[2].mxu1 %v700_v26 }
 0x14b   :  { %2105 = vmatpush3.bf16.msra.mxu1 %v2340_v50  ;;  %1945 = vmatprep.mubr.f32.mxu1 %v690_v28  ;;  %v2377_v50 = vpack.c.bf16 %v1178_v47, %v1175_v46 }
 0x14c   :  { %2107 = vmatprep.subr.bf16.mxu1 %v2344_v59 }
 0x14d   :  { %2115 = vmatprep.subr.bf16.mxu0 %v2377_v50 }
 0x14e   :  { %2117 = vmatpush3.bf16.msra.mxu0 %v2377_v50 }
 0x14f   :  { %2109 = vmatpush3.bf16.msra.mxu1 %v2344_v59  ;;  %v2118_v59 = vpack.c.bf16 %v1269_v56, %v1262_v55 }
 0x151   :  { %2119 = vmatprep.subr.bf16.mxu0 %v2118_v59 }
 0x152   :  { %1946 = vmatmul.mubr.f32.vlgmr.msra.gmra.mrb[2].mxu1 %v700_v26 }
 0x225   :  { %v1947_v6 = vpop.f32.mrb[2].mxu1 }
 0x226   :  { %v2162_v7 = vadd.f32 %v1947_v6, %v1706_v5  ;;  %v1139_v8 = vpop.f32.mrb[3].mxu1 }
 0x227   :  { %v2163_v9 = vadd.f32 %v1706_v5, %v1139_v8 }
 0x228   :  { %v1150_v10 = vmax.f32 %v2162_v7, 0.0 }
 0x229   :  { %v1149_v11 = vmax.f32 %v2163_v9, 0.0 }
 0x22a   :  { %v1166_v12 = vsel %vm67_vm0, %v1150_v10, 0 }
 0x22b   :  { %v1247_v13 = vand.u32 4294901760, %v1166_v12  ;;  %v1163_v14 = vsel %vm67_vm0, %v1149_v11, 0 }
 0x22c   :  { %v1237_v15 = vand.u32 4294901760, %v1163_v14 }
 0x22d   :  { %v1248_v16 = vsub.f32 %v1166_v12, %v1247_v13 }
 0x22e   :  { %v1238_v17 = vsub.f32 %v1163_v14, %v1237_v15 }
 0x22f   :  { %v1249_v18 = vand.u32 4294901760, %v1248_v16 }
 0x230   :  { %v1239_v19 = vand.u32 4294901760, %v1238_v17 }
 0x231   :  { %v1250_v20 = vsub.f32 %v1248_v16, %v1249_v18 }
 0x232   :  { %v1240_v21 = vsub.f32 %v1238_v17, %v1239_v19 }
 0x233   :  { %v1251_v23 = vand.u32 4294901760, %v1250_v20 }
 0x234   :  { %v1241_v22 = vand.u32 4294901760, %v1240_v21 }
 0x236   :  { %1956 = vmatprep.mubr.f32.mxu0 %v1241_v22 }
 0x237   :  { %1957 = vmatmul.mubr.f32.vlgmr.msra.gmra.mrb[2].mxu0 %v1251_v23 }
 0x238   :  { %2121 = vmatpush3.bf16.msra.mxu0 %v2118_v59  ;;  %1967 = vmatprep.mubr.f32.mxu0 %v1237_v15 }
 0x239   :  { %2123 = vmatprep.subr.bf16.mxu0 %v2122_v0 }
 0x23c   :  { %2125 = vmatpush3.bf16.msra.mxu0 %v2122_v0 }
 0x23d   :  { %2127 = vmatprep.subr.bf16.mxu0 %v2126_v1 }
 0x23f   :  { %1968 = vmatmul.mubr.f32.vlgmr.msra.gmra.mrb[2].mxu0 %v1247_v13 }
 0x240   :  { %2129 = vmatpush3.bf16.msra.mxu0 %v2126_v1  ;;  %1978 = vmatprep.mubr.f32.mxu0 %v1238_v17 }
 0x241   :  { %2131 = vmatprep.subr.bf16.mxu0 %v2130_v2 }
 0x244   :  { %2133 = vmatpush3.bf16.msra.mxu0 %v2130_v2 }
 0x245   :  { %2135 = vmatprep.subr.bf16.mxu0 %v2367_v41 }
 0x247   :  { %1979 = vmatmul.mubr.f32.vlgmr.msra.gmra.mrb[2].mxu0 %v1248_v16 }
 0x248   :  { %2137 = vmatpush3.bf16.msra.mxu0 %v2367_v41  ;;  %1989 = vmatprep.mubr.f32.mxu0 %v1239_v19 }
 0x249   :  { %2139 = vmatprep.subr.bf16.mxu0 %v2377_v50 }
 0x24c   :  { %2141 = vmatpush3.bf16.msra.mxu0 %v2377_v50 }
 0x24d   :  { %2143 = vmatprep.subr.bf16.mxu0 %v2142_v3 }
 0x24f   :  { %1990 = vmatmul.mubr.f32.vlgmr.msra.gmra.mrb[2].mxu0 %v1249_v18 }
 0x250   :  { %2145 = vmatpush3.bf16.msra.mxu0 %v2142_v3  ;;  %2000 = vmatprep.mubr.f32.mxu0 %v1237_v15 }
 0x251   :  { %2147 = vmatprep.subr.bf16.mxu0 %v2146_v4 }
 0x254   :  { %2149 = vmatpush3.bf16.msra.mxu0 %v2146_v4 }
 0x255   :  { %2151 = vmatprep.subr.bf16.mxu0 %v2367_v41 }
 0x257   :  { %2001 = vmatmul.mubr.f32.vlgmr.msra.gmra.mrb[2].mxu0 %v1247_v13 }
 0x258   :  { %2153 = vmatpush3.bf16.msra.mxu0 %v2367_v41  ;;  %2011 = vmatprep.mubr.f32.mxu0 %v1237_v15 }
 0x259   :  { %2155 = vmatprep.subr.bf16.mxu0 %v2377_v50 }
 0x25c   :  { %2157 = vmatpush3.bf16.msra.mxu0 %v2377_v50 }
 0x25f   :  { %2012 = vmatmul.mubr.f32.vlgmr.msra.gmra.mrb[2].mxu0 %v1247_v13 }
 0x332   :  { %v2013_v25 = vpop.f32.mrb[2].mxu0 }
 0x333   :  { %v2164_v26 = vadd.f32 %v2013_v25, %v1707_v24  ;;  %v1686_v27 = vpop.f32.mrb[3].mxu0 }
 0x334   :  { %v2165_v28 = vadd.f32 %v1707_v24, %v1686_v27 }
 0x335   :  { %1698 = vst.msk [vmem:[%s2410_s7 + $0x8] sm:$0xff] %vm1696_vm1, %v2164_v26 }
 0x336   :  { %1697 = vst.msk [vmem:[%s2410_s7] sm:$0xff] %vm1696_vm1, %v2165_v28 }
 0x337   :  { %1703 = vsyncpa [#allocation3], 1 }
 0x338   :  { %1704 = vsyncpa [#allocation5], 1 }

</bundles_post_ra>
